<compile_context>
chip_gen: v6e
topology: v6e:2x2x1
jax: 0.10.0
libtpu: 0.0.40
codegen_flags: <defaults>
</compile_context>

<pallas_src>
import functools

import jax
import jax.numpy as jnp
from jax.experimental import pallas as pl
from jax.experimental.pallas import tpu as pltpu

IN_FEATURES = 329
OUT_FEATURES = 64
_DEFAULT_TM = 4096   # tile size in ORIGINAL rows (before 2-way folding)
_TM_FLOOR = 512      # don't shrink tiles below this many original rows


def _linear_kernel(x_ref, w_ref, b_ref, o_ref):
    # x_ref: (tm, K)  w_ref: (K, N)  b_ref: (1, N)  o_ref: (tm, N)
    acc = jnp.dot(x_ref[...], w_ref[...], preferred_element_type=jnp.float32)
    o_ref[...] = (acc + b_ref[...]).astype(o_ref.dtype)


def _round_up(x, m):
    return (x + m - 1) // m * m


def _cdiv(a, b):
    return -(-a // b)


@functools.partial(jax.jit, static_argnames=("tm",))
def encoder_forward(x, w, b, tm=_DEFAULT_TM):
    """x: (B, S, 329) float32 -> (B, S, 64) float32 (the l1 projection)."""
    B, S, K = x.shape
    assert K == IN_FEATURES
    M = B * S

    # 2-way row folding for a lane-dense (128-wide) output when M is even.
    fold = 2 if (M % 2 == 0 and M >= 2) else 1
    m_rows = M // fold
    k_eff = K * fold
    n_eff = OUT_FEATURES * fold

    x2d = x.reshape(m_rows, k_eff)  # free: identical row-major layout

    if fold == 2:
        zeros = jnp.zeros_like(w)
        # blockdiag(W, W): (658, 128)
        w_eff = jnp.concatenate(
            [jnp.concatenate([w, zeros], axis=1),
             jnp.concatenate([zeros, w], axis=1)], axis=0)
        b_eff = jnp.concatenate([b, b], axis=-1)  # (1, 128)
    else:
        w_eff, b_eff = w, b

    # --- tile selection (all static Python ints) ------------------------
    tm_rows = max(8 * fold, tm)          # requested tile, in original rows
    tmf = max(8, tm_rows // fold)        # tile in folded rows
    # Target >=~8 grid steps (v7x megacore + balanced partial last block),
    # but never smaller than ~512 original rows of work per step.
    cap = max(max(8, _TM_FLOOR // fold), _round_up(_cdiv(m_rows, 8), 8))
    tmf = min(tmf, cap)
    tmf = max(8, min(tmf, _round_up(m_rows, 8)))
    grid = (pl.cdiv(m_rows, tmf),)

    itemsize = jnp.dtype(x.dtype).itemsize
    cost = pl.CostEstimate(
        flops=2 * M * K * OUT_FEATURES,
        transcendentals=0,
        bytes_accessed=(m_rows * k_eff + k_eff * n_eff + n_eff
                        + m_rows * n_eff) * itemsize,
    )

    out2d = pl.pallas_call(
        _linear_kernel,
        out_shape=jax.ShapeDtypeStruct((m_rows, n_eff), x.dtype),
        grid=grid,
        in_specs=[
            # row tile of the (folded) input; K kept whole (== full array
            # dim).  Partial last block is masked by Pallas.
            pl.BlockSpec((tmf, k_eff), lambda i: (i, 0)),
            # full weight, resident across all grid steps (no re-DMA)
            pl.BlockSpec((k_eff, n_eff), lambda i: (0, 0)),
            # bias row, resident
            pl.BlockSpec((1, n_eff), lambda i: (0, 0)),
        ],
        out_specs=pl.BlockSpec((tmf, n_eff), lambda i: (i, 0)),
        compiler_params=pltpu.CompilerParams(
            dimension_semantics=("parallel",),
            vmem_limit_bytes=32 << 20,  # headroom on v5e; no-op on v6e/v7x
        ),
        cost_estimate=cost,
    )(x2d, w_eff, b_eff)

    # (m_rows, fold*64) -> (B, S, 64): free row-major relabel.
    return out2d.reshape(B, S, OUT_FEATURES)


def init_params(key):
    """Deterministic synthetic parameters for nn.Linear(329, 64)."""
    kw, kb = jax.random.split(key)
    bound = 1.0 / jnp.sqrt(IN_FEATURES)
    # stored as (in, out) so the kernel does x @ w directly
    w = jax.random.uniform(
        kw, (IN_FEATURES, OUT_FEATURES), jnp.float32, -bound, bound
    )
    b = jax.random.uniform(kb, (1, OUT_FEATURES), jnp.float32, -bound, bound)
    return w, b


if __name__ == "__main__":
    key = jax.random.PRNGKey(0)
    kx, kp = jax.random.split(key)

    # --- small default shapes (even M -> folded, lane-dense output path) ---
    B, S = 2, 8
    x = jax.random.normal(kx, (B, S, IN_FEATURES), jnp.float32)
    sequence_lengths = jnp.full((B,), S, jnp.int32)  # unused by forward()

    w, b = init_params(kp)

    out = encoder_forward(x, w, b)
    jax.block_until_ready(out)

    ref = (x.reshape(-1, IN_FEATURES) @ w + b).reshape(B, S, OUT_FEATURES)
    assert out.shape == (B, S, OUT_FEATURES)
    assert jnp.allclose(out, ref, atol=1e-4, rtol=1e-4)

    # --- multi-step grid with a partial (masked) last block, folded path ---
    B2, S2 = 3, 100  # M = 300 -> 150 folded rows; tm=256 -> tile 128 -> grid 2
    x2 = jax.random.normal(jax.random.PRNGKey(1), (B2, S2, IN_FEATURES),
                           jnp.float32)
    out2 = encoder_forward(x2, w, b, tm=256)
    jax.block_until_ready(out2)
    ref2 = (x2.reshape(-1, IN_FEATURES) @ w + b).reshape(B2, S2, OUT_FEATURES)
    assert out2.shape == (B2, S2, OUT_FEATURES)
    assert jnp.allclose(out2, ref2, atol=1e-4, rtol=1e-4)

    # --- odd M -> unfolded fallback path (64-wide output) ---
    B3, S3 = 1, 7
    x3 = jax.random.normal(jax.random.PRNGKey(2), (B3, S3, IN_FEATURES),
                           jnp.float32)
    out3 = encoder_forward(x3, w, b)
    jax.block_until_ready(out3)
    ref3 = (x3.reshape(-1, IN_FEATURES) @ w + b).reshape(B3, S3, OUT_FEATURES)
    assert out3.shape == (B3, S3, OUT_FEATURES)
    assert jnp.allclose(out3, ref3, atol=1e-4, rtol=1e-4)

    print("KERNEL_OK")
</pallas_src>

<mosaic_0001>
module attributes {stable_mosaic.version = 11 : i64} {
  func.func @_linear_kernel(%arg0: i32, %arg1: memref<8x658xf32, #tpu.memory_space<vmem>>, %arg2: memref<658x128xf32, #tpu.memory_space<vmem>>, %arg3: memref<1x128xf32, #tpu.memory_space<vmem>>, %arg4: memref<8x128xf32, #tpu.memory_space<vmem>>) attributes {dimension_semantics = [#tpu.dimension_semantics<parallel>], iteration_bounds = array<i64: 1>, scalar_prefetch = 0 : i64, scratch_operands = 0 : i64, tpu.core_type = #tpu.core_type<tc>, window_params = [{transform_indices = @transform_0, window_bounds = array<i64: 8, 658>}, {pipeline_mode = #tpu.pipeline_mode<synchronous>, transform_indices = @transform_1, window_bounds = array<i64: 658, 128>}, {pipeline_mode = #tpu.pipeline_mode<synchronous>, transform_indices = @transform_2, window_bounds = array<i64: 1, 128>}, {transform_indices = @transform_3, window_bounds = array<i64: 8, 128>}]} {
    %c0 = arith.constant 0 : index
    %c0_0 = arith.constant 0 : index
    %0 = vector.load %arg1[%c0, %c0_0] : memref<8x658xf32, #tpu.memory_space<vmem>>, vector<8x658xf32>
    %c0_1 = arith.constant 0 : index
    %c0_2 = arith.constant 0 : index
    %1 = vector.load %arg2[%c0_1, %c0_2] : memref<658x128xf32, #tpu.memory_space<vmem>>, vector<658x128xf32>
    %cst = arith.constant dense<0.000000e+00> : vector<8x128xf32>
    %2 = tpu.matmul %0, %1, %cst {dimension_numbers = #tpu.dot_dimension_numbers<[1], [0], [0], [1], [0, 0, 1, 1], [], []>} : vector<8x658xf32>, vector<658x128xf32>, vector<8x128xf32> -> vector<8x128xf32>
    %c0_3 = arith.constant 0 : index
    %c0_4 = arith.constant 0 : index
    %3 = vector.load %arg3[%c0_3, %c0_4] : memref<1x128xf32, #tpu.memory_space<vmem>>, vector<1x128xf32>
    %4 = vector.broadcast %3 : vector<1x128xf32> to vector<8x128xf32>
    %5 = arith.addf %2, %4 : vector<8x128xf32>
    %c0_5 = arith.constant 0 : index
    %c0_6 = arith.constant 0 : index
    %6 = vector.load %arg4[%c0_5, %c0_6] : memref<8x128xf32, #tpu.memory_space<vmem>>, vector<8x128xf32>
    tpu.vector_store %arg4[%c0_5, %c0_6], %5 {strides = array<i32>} : memref<8x128xf32, #tpu.memory_space<vmem>>, vector<8x128xf32>,
    return
  }
  func.func @transform_0(%arg0: i32) -> (i32, i32) {
    %c0_i32 = arith.constant 0 : i32
    %c0_i32_0 = arith.constant 0 : i32
    return %arg0, %c0_i32 : i32, i32
  }
  func.func @transform_1(%arg0: i32) -> (i32, i32) {
    %c0_i32 = arith.constant 0 : i32
    %c0_i32_0 = arith.constant 0 : i32
    %c0_i32_1 = arith.constant 0 : i32
    return %c0_i32, %c0_i32_0 : i32, i32
  }
  func.func @transform_2(%arg0: i32) -> (i32, i32) {
    %c0_i32 = arith.constant 0 : i32
    %c0_i32_0 = arith.constant 0 : i32
    %c0_i32_1 = arith.constant 0 : i32
    return %c0_i32, %c0_i32_0 : i32, i32
  }
  func.func @transform_3(%arg0: i32) -> (i32, i32) {
    %c0_i32 = arith.constant 0 : i32
    %c0_i32_0 = arith.constant 0 : i32
    return %arg0, %c0_i32 : i32, i32
  }
}

</mosaic_0001>

<bundles_post_ra>
// kernel: encoder_forward.1
= control target key start
LH: loop header
LB: loop body
LE: loop exit
PB: predicated region body
PF: predicated region fallthrough
CT: control target
= control target key end

     0   :  { %v407_v3 = vmov 0.0   ;;  %vm114_vm0 = vcmask 1041408   ;;  %vm110_vm1 = vcmask 146432   ;;  %s720_s1 = inlined_call_operand.vmem [shape: f32[658,128], index: 1, kind: input, shape index: {}]   ;;  %s721_s0 = inlined_call_operand.vmem [shape: f32[8,658], index: 0, kind: input, shape index: {}]   ;;  %s722_s2 = inlined_call_operand.vmem [shape: f32[1,128], index: 2, kind: input, shape index: {}]   ;;  %s723_s3 = inlined_call_operand.vmem [shape: f32[8,128], index: 3, kind: output, shape index: {}]  }
   0x1   :  { %v51_v0 = vld [vmem:[%s720_s1 + $0xf8] sm:$0xff]  ;;  %v50_v2 = vld [vmem:[%s720_s1 + $0xf0] sm:$0xff]  ;;  %258 = vmatprep.subr.mxu0 %v407_v3  ;;  %v49_v5 = vld [vmem:[%s720_s1 + $0xe8] sm:$0xff] }
   0x2   :  { %v35_v1 = vld [vmem:[%s720_s1 + $0x78] sm:$0xff]  ;;  %336 = vmatprep.subr.mxu1 %v51_v0  ;;  %v34_v4 = vld [vmem:[%s720_s1 + $0x70] sm:$0xff]  ;;  %v33_v6 = vld [vmem:[%s720_s1 + $0x68] sm:$0xff] }
   0x3   :  { %337 = vmatpush3.msra.mxu1 %v35_v1  ;;  %v48_v7 = vld [vmem:[%s720_s1 + $0xe0] sm:$0xff]  ;;  %v47_v9 = vld [vmem:[%s720_s1 + $0xd8] sm:$0xff]  ;;  %v46_v11 = vld [vmem:[%s720_s1 + $0xd0] sm:$0xff] }
   0x4   :  { %338 = vmatprep.subr.mxu1 %v50_v2  ;;  %v32_v8 = vld [vmem:[%s720_s1 + $0x60] sm:$0xff]  ;;  %v31_v10 = vld [vmem:[%s720_s1 + $0x58] sm:$0xff]  ;;  %v30_v12 = vld [vmem:[%s720_s1 + $0x50] sm:$0xff] }
   0x5   :  { %339 = vmatpush3.msra.mxu1 %v34_v4  ;;  %v45_v13 = vld [vmem:[%s720_s1 + $0xc8] sm:$0xff]  ;;  %v99_v16 = vld [vmem:[%s720_s1 + $0x278] sm:$0xff]  ;;  %v44_v17 = vld [vmem:[%s720_s1 + $0xc0] sm:$0xff] }
   0x6   :  { %340 = vmatprep.subr.mxu1 %v49_v5  ;;  %v15_v14 = vld [vmem:[%s721_s0 + $0x8] sm:$0xff]  ;;  %259 = vmatpush1.msra.mxu0 %v99_v16  ;;  %v98_v18 = vld [vmem:[%s720_s1 + $0x270] sm:$0xff]  ;;  %v28_v19 = vld [vmem:[%s720_s1 + $0x40] sm:$0xff] }
   0x7   :  { %341 = vmatpush3.msra.mxu1 %v33_v6  ;;  %v29_v15 = vld [vmem:[%s720_s1 + $0x48] sm:$0xff]  ;;  %182 = vmatprep.mubr.f32.mxu1 %v15_v14  ;;  %v43_v21 = vld [vmem:[%s720_s1 + $0xb8] sm:$0xff]  ;;  %v96_v23 = vld [vmem:[%s720_s1 + $0x260] sm:$0xff] }
   0x8   :  { %342 = vmatprep.subr.mxu1 %v48_v7  ;;  %260 = vmatprep.subr.mxu0 %v407_v3  ;;  %v97_v20 = vld [vmem:[%s720_s1 + $0x268] sm:$0xff]  ;;  %v27_v22 = vld [vmem:[%s720_s1 + $0x38] sm:$0xff]  ;;  %v42_v24 = vld [vmem:[%s720_s1 + $0xb0] sm:$0xff] }
   0x9   :  { %343 = vmatpush3.msra.mxu1 %v32_v8  ;;  %261 = vmatpush1.msra.mxu0 %v98_v18  ;;  %v26_v25 = vld [vmem:[%s720_s1 + $0x30] sm:$0xff]  ;;  %v95_v26 = vld [vmem:[%s720_s1 + $0x258] sm:$0xff]  ;;  %v41_v27 = vld [vmem:[%s720_s1 + $0xa8] sm:$0xff] }
   0xa   :  { %344 = vmatprep.subr.mxu1 %v47_v9  ;;  %262 = vmatprep.subr.mxu0 %v407_v3  ;;  %v25_v28 = vld [vmem:[%s720_s1 + $0x28] sm:$0xff]  ;;  %v94_v29 = vld [vmem:[%s720_s1 + $0x250] sm:$0xff]  ;;  %v40_v30 = vld [vmem:[%s720_s1 + $0xa0] sm:$0xff] }
   0xb   :  { %345 = vmatpush3.msra.mxu1 %v31_v10  ;;  %263 = vmatpush1.msra.mxu0 %v97_v20  ;;  %v24_v31 = vld [vmem:[%s720_s1 + $0x20] sm:$0xff]  ;;  %v93_v32 = vld [vmem:[%s720_s1 + $0x248] sm:$0xff]  ;;  %v39_v33 = vld [vmem:[%s720_s1 + $0x98] sm:$0xff] }
   0xc   :  { %346 = vmatprep.subr.mxu1 %v46_v11  ;;  %264 = vmatprep.subr.mxu0 %v407_v3  ;;  %v23_v34 = vld [vmem:[%s720_s1 + $0x18] sm:$0xff]  ;;  %v92_v35 = vld [vmem:[%s720_s1 + $0x240] sm:$0xff]  ;;  %v38_v36 = vld [vmem:[%s720_s1 + $0x90] sm:$0xff] }
   0xd   :  { %347 = vmatpush3.msra.mxu1 %v30_v12  ;;  %265 = vmatpush1.msra.mxu0 %v96_v23  ;;  %v22_v37 = vld [vmem:[%s720_s1 + $0x10] sm:$0xff]  ;;  %v91_v38 = vld [vmem:[%s720_s1 + $0x238] sm:$0xff]  ;;  %v37_v39 = vld [vmem:[%s720_s1 + $0x88] sm:$0xff] }
   0xe   :  { %348 = vmatprep.subr.mxu1 %v45_v13  ;;  %266 = vmatprep.subr.mxu0 %v407_v3  ;;  %v21_v40 = vld [vmem:[%s720_s1 + $0x8] sm:$0xff]  ;;  %v90_v41 = vld [vmem:[%s720_s1 + $0x230] sm:$0xff]  ;;  %v36_v42 = vld [vmem:[%s720_s1 + $0x80] sm:$0xff] }
   0xf   :  { %349 = vmatpush3.msra.mxu1 %v29_v15  ;;  %267 = vmatpush1.msra.mxu0 %v95_v26  ;;  %v20_v43 = vld [vmem:[%s720_s1] sm:$0xff]  ;;  %v89_v44 = vld [vmem:[%s720_s1 + $0x228] sm:$0xff]  ;;  %v83_v46 = vld [vmem:[%s720_s1 + $0x1f8] sm:$0xff] }
  0x10   :  { %350 = vmatprep.subr.mxu1 %v44_v17  ;;  %268 = vmatprep.subr.mxu0 %v407_v3  ;;  %v14_v45 = vld [vmem:[%s721_s0] sm:$0xff]  ;;  %v67_v47 = vld [vmem:[%s720_s1 + $0x178] sm:$0xff]  ;;  %v82_v48 = vld [vmem:[%s720_s1 + $0x1f0] sm:$0xff] }
  0x11   :  { %351 = vmatpush3.msra.mxu1 %v28_v19  ;;  %269 = vmatpush1.msra.mxu0 %v94_v29  ;;  %v88_v49 = vld [vmem:[%s720_s1 + $0x220] sm:$0xff]  ;;  %v66_v50 = vld [vmem:[%s720_s1 + $0x170] sm:$0xff]  ;;  %v81_v51 = vld [vmem:[%s720_s1 + $0x1e8] sm:$0xff] }
  0x12   :  { %352 = vmatprep.subr.mxu1 %v43_v21  ;;  %270 = vmatprep.subr.mxu0 %v407_v3  ;;  %v87_v52 = vld [vmem:[%s720_s1 + $0x218] sm:$0xff]  ;;  %v65_v53 = vld [vmem:[%s720_s1 + $0x168] sm:$0xff]  ;;  %v80_v54 = vld [vmem:[%s720_s1 + $0x1e0] sm:$0xff] }
  0x13   :  { %353 = vmatpush3.msra.mxu1 %v27_v22  ;;  %271 = vmatpush1.msra.mxu0 %v93_v32  ;;  %v86_v55 = vld [vmem:[%s720_s1 + $0x210] sm:$0xff]  ;;  %v64_v56 = vld [vmem:[%s720_s1 + $0x160] sm:$0xff]  ;;  %v79_v57 = vld [vmem:[%s720_s1 + $0x1d8] sm:$0xff] }
  0x14   :  { %354 = vmatprep.subr.mxu1 %v42_v24  ;;  %272 = vmatprep.subr.mxu0 %v407_v3  ;;  %v85_v58 = vld [vmem:[%s720_s1 + $0x208] sm:$0xff]  ;;  %v63_v59 = vld [vmem:[%s720_s1 + $0x158] sm:$0xff]  ;;  %v78_v60 = vld [vmem:[%s720_s1 + $0x1d0] sm:$0xff] }
  0x15   :  { %355 = vmatpush3.msra.mxu1 %v26_v25  ;;  %273 = vmatpush1.msra.mxu0 %v92_v35  ;;  %v84_v61 = vld [vmem:[%s720_s1 + $0x200] sm:$0xff]  ;;  %v62_v62 = vld [vmem:[%s720_s1 + $0x150] sm:$0xff]  ;;  %v77_v63 = vld [vmem:[%s720_s1 + $0x1c8] sm:$0xff] }
  0x16   :  { %356 = vmatprep.subr.mxu1 %v41_v27  ;;  %274 = vmatprep.subr.mxu0 %v407_v3  ;;  %v17_v0 = vld [vmem:[%s721_s0 + $0x18] sm:$0xff]  ;;  %v61_v1 = vld [vmem:[%s720_s1 + $0x148] sm:$0xff]  ;;  %v102_v2 = vld [vmem:[%s720_s1 + $0x290] sm:$0x3] }
  0x17   :  { %357 = vmatpush3.msra.mxu1 %v25_v28  ;;  %275 = vmatpush1.msra.mxu0 %v91_v38  ;;  %v76_v4 = vld [vmem:[%s720_s1 + $0x1c0] sm:$0xff]  ;;  %v101_v6 = vld [vmem:[%s720_s1 + $0x288] sm:$0xff]  ;;  %v75_v7 = vld [vmem:[%s720_s1 + $0x1b8] sm:$0xff] }
  0x18   :  { %358 = vmatprep.subr.mxu1 %v40_v30  ;;  %276 = vmatprep.subr.mxu0 %v407_v3  ;;  %v60_v5 = vld [vmem:[%s720_s1 + $0x140] sm:$0xff]  ;;  %v59_v8 = vld [vmem:[%s720_s1 + $0x138] sm:$0xff]  ;;  %v74_v10 = vld [vmem:[%s720_s1 + $0x1b0] sm:$0xff] }
  0x19   :  { %359 = vmatpush3.msra.mxu1 %v24_v31  ;;  %277 = vmatpush1.msra.mxu0 %v90_v41  ;;  %v100_v9 = vld [vmem:[%s720_s1 + $0x280] sm:$0xff]  ;;  %v19_v11 = vld [vmem:[%s721_s0 + $0x28] sm:$0xff]  ;;  %v58_v12 = vld [vmem:[%s720_s1 + $0x130] sm:$0xff] }
  0x1a   :  { %360 = vmatprep.subr.mxu1 %v39_v33  ;;  %278 = vmatprep.subr.mxu0 %v407_v3  ;;  %v18_v13 = vld [vmem:[%s721_s0 + $0x20] sm:$0xff]  ;;  %v73_v14 = vld [vmem:[%s720_s1 + $0x1a8] sm:$0xff]  ;;  %v71_v17 = vld [vmem:[%s720_s1 + $0x198] sm:$0xff] }
  0x1b   :  { %361 = vmatpush3.msra.mxu1 %v23_v34  ;;  %279 = vmatpush1.msra.mxu0 %v89_v44  ;;  %v57_v15 = vld [vmem:[%s720_s1 + $0x128] sm:$0xff]  ;;  %v56_v16 = vld [vmem:[%s720_s1 + $0x120] sm:$0xff]  ;;  %v55_v18 = vld [vmem:[%s720_s1 + $0x118] sm:$0xff] }
  0x1c   :  { %362 = vmatprep.subr.mxu1 %v38_v36  ;;  %280 = vmatprep.subr.mxu0 %v407_v3  ;;  %v70_v19 = vld [vmem:[%s720_s1 + $0x190] sm:$0xff]  ;;  %v69_v21 = vld [vmem:[%s720_s1 + $0x188] sm:$0xff]  ;;  %v68_v23 = vld [vmem:[%s720_s1 + $0x180] sm:$0xff] }
  0x1d   :  { %363 = vmatpush3.msra.mxu1 %v22_v37  ;;  %281 = vmatpush1.msra.mxu0 %v88_v49  ;;  %v54_v20 = vld [vmem:[%s720_s1 + $0x110] sm:$0xff]  ;;  %v53_v22 = vld [vmem:[%s720_s1 + $0x108] sm:$0xff]  ;;  %v52_v24 = vld [vmem:[%s720_s1 + $0x100] sm:$0xff] }
  0x1e   :  { %364 = vmatprep.subr.mxu1 %v37_v39  ;;  %282 = vmatprep.subr.mxu0 %v407_v3  ;;  %v16_v25 = vld [vmem:[%s721_s0 + $0x10] sm:$0xff]  ;;  %v333_v31 = vld [vmem:[%s722_s2] ss:$0 sm:$0xff] }
  0x1f   :  { %365 = vmatpush3.msra.mxu1 %v21_v40  ;;  %283 = vmatpush1.msra.mxu0 %v87_v52 }
  0x20   :  { %366 = vmatprep.subr.mxu1 %v36_v42  ;;  %284 = vmatprep.subr.mxu0 %v407_v3 }
  0x21   :  { %367 = vmatpush3.msra.mxu1 %v20_v43  ;;  %285 = vmatpush1.msra.mxu0 %v86_v55 }
  0x22   :  { %183 = vmatmul.mubr.f32.vlgmr.msra.gmra.mxu1 %v14_v45  ;;  %371 = vmatprep.subr.mxu1 %v83_v46 }
  0x23   :  { %372 = vmatpush3.msra.mxu1 %v67_v47  ;;  %286 = vmatprep.subr.mxu0 %v407_v3 }
  0x24   :  { %373 = vmatprep.subr.mxu1 %v82_v48  ;;  %287 = vmatpush1.msra.mxu0 %v85_v58 }
  0x25   :  { %374 = vmatpush3.msra.mxu1 %v66_v50  ;;  %288 = vmatprep.subr.mxu0 %v407_v3 }
  0x26   :  { %375 = vmatprep.subr.mxu1 %v81_v51  ;;  %289 = vmatpush1.msra.mxu0 %v84_v61 }
  0x27   :  { %376 = vmatpush3.msra.mxu1 %v65_v53  ;;  %316 = vmatprep.subr.mxu0 %v407_v3 }
  0x28   :  { %377 = vmatprep.subr.mxu1 %v80_v54  ;;  %252 = vmatprep.mubr.f32.mxu1 %v17_v0 }
  0x29   :  { %378 = vmatpush3.msra.mxu1 %v64_v56  ;;  %334 = vmatpush2.msk.msra.mxu0 %vm114_vm0, %v102_v2 }
  0x2a   :  { %379 = vmatprep.subr.mxu1 %v79_v57  ;;  %318 = vmatprep.subr.mxu0 %v407_v3 }
  0x2b   :  { %380 = vmatpush3.msra.mxu1 %v63_v59  ;;  %319 = vmatpush2.msra.mxu0 %v101_v6 }
  0x2c   :  { %381 = vmatprep.subr.mxu1 %v78_v60  ;;  %320 = vmatprep.subr.mxu0 %v407_v3  ;;  %v72_v3 = vld [vmem:[%s720_s1 + $0x1a0] sm:$0xff] }
  0x2d   :  { %382 = vmatpush3.msra.mxu1 %v62_v62  ;;  %321 = vmatpush2.msra.mxu0 %v100_v9 }
  0x2e   :  { %383 = vmatprep.subr.mxu1 %v77_v63  ;;  %335 = vmatprep.mubr.msk.f32.mxu0 %vm110_vm1, %v19_v11 }
  0x2f   :  { %384 = vmatpush3.msra.mxu1 %v61_v1  ;;  %323 = vmatmul.mubr.f32.vlgmr.msra.gmra.mxu0 %v18_v13 }
  0x30   :  { %385 = vmatprep.subr.mxu1 %v76_v4 }
  0x31   :  { %386 = vmatpush3.msra.mxu1 %v60_v5 }
  0x32   :  { %387 = vmatprep.subr.mxu1 %v75_v7 }
  0x33   :  { %388 = vmatpush3.msra.mxu1 %v59_v8 }
  0x34   :  { %389 = vmatprep.subr.mxu1 %v74_v10 }
  0x35   :  { %390 = vmatpush3.msra.mxu1 %v58_v12 }
  0x36   :  { %391 = vmatprep.subr.mxu1 %v73_v14 }
  0x37   :  { %392 = vmatpush3.msra.mxu1 %v57_v15 }
  0x38   :  { %393 = vmatprep.subr.mxu1 %v72_v3 }
  0x39   :  { %394 = vmatpush3.msra.mxu1 %v56_v16 }
  0x3a   :  { %395 = vmatprep.subr.mxu1 %v71_v17 }
  0x3b   :  { %396 = vmatpush3.msra.mxu1 %v55_v18 }
  0x3c   :  { %397 = vmatprep.subr.mxu1 %v70_v19 }
  0x3d   :  { %398 = vmatpush3.msra.mxu1 %v54_v20 }
  0x3e   :  { %399 = vmatprep.subr.mxu1 %v69_v21 }
  0x3f   :  { %400 = vmatpush3.msra.mxu1 %v53_v22 }
  0x40   :  { %401 = vmatprep.subr.mxu1 %v68_v23 }
  0x41   :  { %402 = vmatpush3.msra.mxu1 %v52_v24 }
  0x42   :  { %253 = vmatmul.mubr.f32.vlgmr.msra.gmra.mxu1 %v16_v25 }
  0xe2   :  { %v368_v28 = vpop.f32.mrf.mxu1 }
  0xe4   :  { %v369_v29 = vpop.f32.mrf.mxu1 }
  0xe5   :  { %v370_v30 = vadd.f32 %v369_v29, %v368_v28 }
  0xe7   :  { %v185_v34 = vadd.f32 %v370_v30, %v333_v31 }
  0xef   :  { %v324_v26 = vpop.f32.mrf.mxu0 }
  0xf1   :  { %v326_v27 = vpop.f32.mrf.mxu0 }
 0x102   :  { %v403_v32 = vpop.f32.mrf.mxu1 }
 0x104   :  { %v404_v33 = vpop.f32.mrf.mxu1 }
 0x105   :  { %v405_v35 = vadd.f32 %v404_v33, %v403_v32 }
 0x107   :  { %v255_v36 = vadd.f32 %v405_v35, %v185_v34 }
 0x109   :  { %v325_v37 = vadd.f32 %v324_v26, %v255_v36 }
 0x10b   :  { %328 = vst [vmem:[%s723_s3] sm:$0xff] %v325_v37 }

</bundles_post_ra>
